<compile_context>
chip_gen: v6e
topology: v6e:2x2x1
jax: 0.10.0
libtpu: 0.0.40
codegen_flags: <defaults>
</compile_context>

<pallas_src>
import functools

import jax
import jax.numpy as jnp
from jax.experimental import pallas as pl
from jax.experimental.pallas import tpu as pltpu

_LANE = 128
_SUBLANE = 8


def _round_up(x, m):
    return ((x + m - 1) // m) * m


def _policy_kernel(x_ref, w1_ref, b1_ref, w2_ref, b2_ref, w3_ref, b3_ref, o_ref):
    # One batch tile, fully fused in VMEM: 3 MXU matmuls, VPU ReLU, EUP tanh,
    # and a single FMA epilogue (50*tanh(a) + 50).
    x = x_ref[...]
    w1 = w1_ref[...]
    w2 = w2_ref[...]
    w3 = w3_ref[...]

    # Layers 1-2: dot operands in the weights' dtype (bf16 on the fast path),
    # f32 accumulation; bias add / ReLU stay f32 (v5e has no bf16 VPU anyway).
    h = jnp.dot(x.astype(w1.dtype), w1, preferred_element_type=jnp.float32) + b1_ref[...]
    h = jnp.maximum(h, 0.0)
    h = jnp.dot(h.astype(w2.dtype), w2, preferred_element_type=jnp.float32) + b2_ref[...]
    h = jnp.maximum(h, 0.0)

    # Layer 3 + epilogue kept in f32: the 50x scale amplifies rounding error.
    a = jnp.dot(h, w3, preferred_element_type=jnp.float32) + b3_ref[...]
    o_ref[...] = 50.0 * jnp.tanh(a) + 50.0


def pad_params(params, dot_dtype=jnp.bfloat16):
    """One-time packing of the MLP parameters (outside the per-step hot path).

    * hidden dim padded to a multiple of 128 (lane-dense h1/h2, full MXU tiles);
      zero padding is exact: padded K rows / N columns contribute nothing.
    * obs_dim / act_dim left unpadded (kernel blocks use the full array dims).
    * w1/w2 cast to `dot_dtype` (bf16 default); w3 and all biases stay f32.
    """
    w1, b1, w2, b2, w3, b3 = (params[k] for k in ("w1", "b1", "w2", "b2", "w3", "b3"))
    obs_dim, hidden = w1.shape
    act_dim = w3.shape[1]
    hid_p = _round_up(hidden, _LANE)

    def pad2(a, rows, cols, dtype):
        a = a if a.ndim == 2 else a.reshape(1, -1)
        a = jnp.pad(a.astype(jnp.float32),
                    ((0, rows - a.shape[0]), (0, cols - a.shape[1])))
        return a.astype(dtype)

    return {
        "w1": pad2(w1, obs_dim, hid_p, dot_dtype),
        "b1": pad2(b1, 1, hid_p, jnp.float32),
        "w2": pad2(w2, hid_p, hid_p, dot_dtype),
        "b2": pad2(b2, 1, hid_p, jnp.float32),
        "w3": pad2(w3, hid_p, act_dim, jnp.float32),
        "b3": pad2(b3, 1, act_dim, jnp.float32),
    }


@functools.partial(jax.jit, static_argnames=("block_b",))
def deterministic_policy_forward(obs, padded_params, block_b=2048):
    """obs: (B, obs_dim).  padded_params: output of pad_params()."""
    p = padded_params
    obs_dim = p["w1"].shape[0]
    hid_p = p["w2"].shape[0]
    act_dim = p["w3"].shape[1]

    B, in_dim = obs.shape
    assert in_dim == obs_dim, (in_dim, obs_dim)

    # Aim for >=4 grid steps when the batch allows it: pipelines the obs-tile
    # DMA behind compute and gives v7x's 2 TensorCores >=2 tiles each.
    target = _round_up(-(-B // 4), _SUBLANE)
    block_b = max(_SUBLANE, min(_round_up(block_b, _SUBLANE), target))
    b_pad = _round_up(B, block_b)

    x = obs.astype(jnp.float32)
    if b_pad != B:
        x = jnp.pad(x, ((0, b_pad - B), (0, 0)))

    const = lambda i: (0, 0)  # weights / biases stay resident across grid steps
    out = pl.pallas_call(
        _policy_kernel,
        out_shape=jax.ShapeDtypeStruct((b_pad, act_dim), jnp.float32),
        grid_spec=pltpu.PrefetchScalarGridSpec(
            num_scalar_prefetch=0,
            grid=(b_pad // block_b,),
            in_specs=[
                pl.BlockSpec((block_b, obs_dim), lambda i: (i, 0)),  # obs streams
                pl.BlockSpec((obs_dim, hid_p), const),
                pl.BlockSpec((1, hid_p), const),
                pl.BlockSpec((hid_p, hid_p), const),
                pl.BlockSpec((1, hid_p), const),
                pl.BlockSpec((hid_p, act_dim), const),
                pl.BlockSpec((1, act_dim), const),
            ],
            out_specs=pl.BlockSpec((block_b, act_dim), lambda i: (i, 0)),
        ),
        compiler_params=pltpu.CompilerParams(
            # Shard batch tiles across v7x's 2 TensorCores; no-op on v5e/v6e.
            dimension_semantics=("parallel",),
        ),
    )(x, p["w1"], p["b1"], p["w2"], p["b2"], p["w3"], p["b3"])

    return out if b_pad == B else out[:B]


def init_params(key, obs_dim, act_dim, hidden_dim=256):
    """PyTorch nn.Linear-style uniform fan-in init, weights as (in, out)."""
    ks = jax.random.split(key, 6)

    def linear(kw, kb, fan_in, fan_out):
        bound = 1.0 / jnp.sqrt(fan_in)
        w = jax.random.uniform(kw, (fan_in, fan_out), jnp.float32, -bound, bound)
        b = jax.random.uniform(kb, (fan_out,), jnp.float32, -bound, bound)
        return w, b

    w1, b1 = linear(ks[0], ks[1], obs_dim, hidden_dim)
    w2, b2 = linear(ks[2], ks[3], hidden_dim, hidden_dim)
    w3, b3 = linear(ks[4], ks[5], hidden_dim, act_dim)
    return {"w1": w1, "b1": b1, "w2": w2, "b2": b2, "w3": w3, "b3": b3}


def ref_forward(x, p):
    h = jnp.maximum(x @ p["w1"] + p["b1"], 0.0)
    h = jnp.maximum(h @ p["w2"] + p["b2"], 0.0)
    return 50.0 * (jnp.tanh(h @ p["w3"] + p["b3"]) + 1.0)


if __name__ == "__main__":
    key = jax.random.PRNGKey(0)
    k_obs, k_params = jax.random.split(key)

    # Module defaults: hidden_dim=256, n_hidden=2.  Small batch/obs/act sizes.
    batch, obs_dim, act_dim, hidden_dim = 8, 16, 8, 256
    obs = jax.random.normal(k_obs, (batch, obs_dim), dtype=jnp.float32)
    params = init_params(k_params, obs_dim, act_dim, hidden_dim)

    expected = ref_forward(obs, params)

    # f32-dot path: tight check against the pure-JAX reference.
    out_f32 = deterministic_policy_forward(obs, pad_params(params, jnp.float32))
    jax.block_until_ready(out_f32)
    assert out_f32.shape == (batch, act_dim)
    assert jnp.allclose(out_f32, expected, atol=1e-3, rtol=1e-3), float(
        jnp.max(jnp.abs(out_f32 - expected)))

    # Default bf16-dot path (layers 1-2 only): perf path for v6e/v7x.  Looser
    # tolerance because the 50x output scale amplifies bf16 operand rounding.
    out_bf16 = deterministic_policy_forward(obs, pad_params(params))
    jax.block_until_ready(out_bf16)
    assert out_bf16.shape == (batch, act_dim)
    assert jnp.allclose(out_bf16, expected, atol=5e-2, rtol=5e-3), float(
        jnp.max(jnp.abs(out_bf16 - expected)))

    print("KERNEL_OK")
</pallas_src>

<mosaic_0001>
module attributes {stable_mosaic.version = 11 : i64} {
  func.func @_policy_kernel(%arg0: i32, %arg1: memref<8x16xf32, #tpu.memory_space<vmem>>, %arg2: memref<16x256xf32, #tpu.memory_space<vmem>>, %arg3: memref<1x256xf32, #tpu.memory_space<vmem>>, %arg4: memref<256x256xf32, #tpu.memory_space<vmem>>, %arg5: memref<1x256xf32, #tpu.memory_space<vmem>>, %arg6: memref<256x8xf32, #tpu.memory_space<vmem>>, %arg7: memref<1x8xf32, #tpu.memory_space<vmem>>, %arg8: memref<8x8xf32, #tpu.memory_space<vmem>>) attributes {dimension_semantics = [#tpu.dimension_semantics<parallel>], iteration_bounds = array<i64: 1>, scalar_prefetch = 0 : i64, scratch_operands = 0 : i64, tpu.core_type = #tpu.core_type<tc>, window_params = [{transform_indices = @transform_0, window_bounds = array<i64: 8, 16>}, {pipeline_mode = #tpu.pipeline_mode<synchronous>, transform_indices = @transform_1, window_bounds = array<i64: 16, 256>}, {pipeline_mode = #tpu.pipeline_mode<synchronous>, transform_indices = @transform_2, window_bounds = array<i64: 1, 256>}, {pipeline_mode = #tpu.pipeline_mode<synchronous>, transform_indices = @transform_3, window_bounds = array<i64: 256, 256>}, {pipeline_mode = #tpu.pipeline_mode<synchronous>, transform_indices = @transform_4, window_bounds = array<i64: 1, 256>}, {pipeline_mode = #tpu.pipeline_mode<synchronous>, transform_indices = @transform_5, window_bounds = array<i64: 256, 8>}, {pipeline_mode = #tpu.pipeline_mode<synchronous>, transform_indices = @transform_6, window_bounds = array<i64: 1, 8>}, {transform_indices = @transform_7, window_bounds = array<i64: 8, 8>}]} {
    %c0 = arith.constant 0 : index
    %c0_0 = arith.constant 0 : index
    %0 = vector.load %arg1[%c0, %c0_0] : memref<8x16xf32, #tpu.memory_space<vmem>>, vector<8x16xf32>
    %c0_1 = arith.constant 0 : index
    %c0_2 = arith.constant 0 : index
    %1 = vector.load %arg2[%c0_1, %c0_2] : memref<16x256xf32, #tpu.memory_space<vmem>>, vector<16x256xf32>
    %c0_3 = arith.constant 0 : index
    %c0_4 = arith.constant 0 : index
    %2 = vector.load %arg4[%c0_3, %c0_4] : memref<256x256xf32, #tpu.memory_space<vmem>>, vector<256x256xf32>
    %c0_5 = arith.constant 0 : index
    %c0_6 = arith.constant 0 : index
    %3 = vector.load %arg6[%c0_5, %c0_6] : memref<256x8xf32, #tpu.memory_space<vmem>>, vector<256x8xf32>
    %cst = arith.constant dense<0.000000e+00> : vector<8x256xf32>
    %4 = tpu.matmul %0, %1, %cst {dimension_numbers = #tpu.dot_dimension_numbers<[1], [0], [0], [1], [0, 0, 1, 1], [], []>} : vector<8x16xf32>, vector<16x256xf32>, vector<8x256xf32> -> vector<8x256xf32>
    %c0_7 = arith.constant 0 : index
    %c0_8 = arith.constant 0 : index
    %5 = vector.load %arg3[%c0_7, %c0_8] : memref<1x256xf32, #tpu.memory_space<vmem>>, vector<1x256xf32>
    %6 = vector.broadcast %5 : vector<1x256xf32> to vector<8x256xf32>
    %7 = arith.addf %4, %6 : vector<8x256xf32>
    %cst_9 = arith.constant 0.000000e+00 : f32
    %8 = vector.broadcast %cst_9 : f32 to vector<8x256xf32>
    %9 = arith.maximumf %7, %8 : vector<8x256xf32>
    %cst_10 = arith.constant dense<0.000000e+00> : vector<8x256xf32>
    %10 = tpu.matmul %9, %2, %cst_10 {dimension_numbers = #tpu.dot_dimension_numbers<[1], [0], [0], [1], [0, 0, 1, 1], [], []>} : vector<8x256xf32>, vector<256x256xf32>, vector<8x256xf32> -> vector<8x256xf32>
    %c0_11 = arith.constant 0 : index
    %c0_12 = arith.constant 0 : index
    %11 = vector.load %arg5[%c0_11, %c0_12] : memref<1x256xf32, #tpu.memory_space<vmem>>, vector<1x256xf32>
    %12 = vector.broadcast %11 : vector<1x256xf32> to vector<8x256xf32>
    %13 = arith.addf %10, %12 : vector<8x256xf32>
    %cst_13 = arith.constant 0.000000e+00 : f32
    %14 = vector.broadcast %cst_13 : f32 to vector<8x256xf32>
    %15 = arith.maximumf %13, %14 : vector<8x256xf32>
    %cst_14 = arith.constant dense<0.000000e+00> : vector<8x8xf32>
    %16 = tpu.matmul %15, %3, %cst_14 {dimension_numbers = #tpu.dot_dimension_numbers<[1], [0], [0], [1], [0, 0, 1, 1], [], []>} : vector<8x256xf32>, vector<256x8xf32>, vector<8x8xf32> -> vector<8x8xf32>
    %c0_15 = arith.constant 0 : index
    %c0_16 = arith.constant 0 : index
    %17 = vector.load %arg7[%c0_15, %c0_16] : memref<1x8xf32, #tpu.memory_space<vmem>>, vector<1x8xf32>
    %18 = vector.broadcast %17 : vector<1x8xf32> to vector<8x8xf32>
    %19 = arith.addf %16, %18 : vector<8x8xf32>
    %20 = math.tanh %19 : vector<8x8xf32>
    %cst_17 = arith.constant 5.000000e+01 : f32
    %21 = vector.broadcast %cst_17 : f32 to vector<8x8xf32>
    %22 = arith.mulf %21, %20 : vector<8x8xf32>
    %cst_18 = arith.constant 5.000000e+01 : f32
    %23 = vector.broadcast %cst_18 : f32 to vector<8x8xf32>
    %24 = arith.addf %22, %23 : vector<8x8xf32>
    %c0_19 = arith.constant 0 : index
    %c0_20 = arith.constant 0 : index
    %25 = vector.load %arg8[%c0_19, %c0_20] : memref<8x8xf32, #tpu.memory_space<vmem>>, vector<8x8xf32>
    tpu.vector_store %arg8[%c0_19, %c0_20], %24 {strides = array<i32>} : memref<8x8xf32, #tpu.memory_space<vmem>>, vector<8x8xf32>,
    return
  }
  func.func @transform_0(%arg0: i32) -> (i32, i32) {
    %c0_i32 = arith.constant 0 : i32
    %c0_i32_0 = arith.constant 0 : i32
    return %arg0, %c0_i32 : i32, i32
  }
  func.func @transform_1(%arg0: i32) -> (i32, i32) {
    %c0_i32 = arith.constant 0 : i32
    %c0_i32_0 = arith.constant 0 : i32
    %c0_i32_1 = arith.constant 0 : i32
    return %c0_i32, %c0_i32_0 : i32, i32
  }
  func.func @transform_2(%arg0: i32) -> (i32, i32) {
    %c0_i32 = arith.constant 0 : i32
    %c0_i32_0 = arith.constant 0 : i32
    %c0_i32_1 = arith.constant 0 : i32
    return %c0_i32, %c0_i32_0 : i32, i32
  }
  func.func @transform_3(%arg0: i32) -> (i32, i32) {
    %c0_i32 = arith.constant 0 : i32
    %c0_i32_0 = arith.constant 0 : i32
    %c0_i32_1 = arith.constant 0 : i32
    return %c0_i32, %c0_i32_0 : i32, i32
  }
  func.func @transform_4(%arg0: i32) -> (i32, i32) {
    %c0_i32 = arith.constant 0 : i32
    %c0_i32_0 = arith.constant 0 : i32
    %c0_i32_1 = arith.constant 0 : i32
    return %c0_i32, %c0_i32_0 : i32, i32
  }
  func.func @transform_5(%arg0: i32) -> (i32, i32) {
    %c0_i32 = arith.constant 0 : i32
    %c0_i32_0 = arith.constant 0 : i32
    %c0_i32_1 = arith.constant 0 : i32
    return %c0_i32, %c0_i32_0 : i32, i32
  }
  func.func @transform_6(%arg0: i32) -> (i32, i32) {
    %c0_i32 = arith.constant 0 : i32
    %c0_i32_0 = arith.constant 0 : i32
    %c0_i32_1 = arith.constant 0 : i32
    return %c0_i32, %c0_i32_0 : i32, i32
  }
  func.func @transform_7(%arg0: i32) -> (i32, i32) {
    %c0_i32 = arith.constant 0 : i32
    %c0_i32_0 = arith.constant 0 : i32
    return %arg0, %c0_i32 : i32, i32
  }
}

</mosaic_0001>

<bundles_post_ra>
// kernel: deterministic_policy_forward.1
= control target key start
LH: loop header
LB: loop body
LE: loop exit
PB: predicated region body
PF: predicated region fallthrough
CT: control target
= control target key end

     0   :  { %12 = vsyncpa [#allocation3], 0  ;;  %s672_s0 = inlined_call_operand.vmem [shape: f32[8,16], index: 0, kind: input, shape index: {}]   ;;  %s673_s1 = inlined_call_operand.vmem [shape: f32[16,256], index: 1, kind: input, shape index: {}]   ;;  %s674_s2 = inlined_call_operand.vmem [shape: f32[1,256], index: 2, kind: input, shape index: {}]   ;;  %s675_s3 = inlined_call_operand.hbm [shape: f32[256,256], index: 3, kind: input, shape index: {}]   ;;  %s676_s4 = inlined_call_operand.vmem [shape: f32[1,256], index: 4, kind: input, shape index: {}]   ;;  %s677_s5 = inlined_call_operand.vmem [shape: f32[256,8], index: 5, kind: input, shape index: {}]   ;;  %s678_s6 = inlined_call_operand.vmem [shape: f32[1,8], index: 6, kind: input, shape index: {}]   ;;  %s679_s7 = inlined_call_operand.hbm [shape: f32[8,8], index: 7, kind: output, shape index: {}]  }
   0x1   :  { %13 = vsyncpa [#allocation4], 0  ;;  %s501_s24 = smov [#allocation2]  }
   0x2   :  { %s25_s25 = sshll.u32 %s501_s24, 4  ;;  %s26_s25 = int_to_ptr.vmem [resolvable:$true] %s25_s25 }
   0x3   :  { %s465_s26 = scalar_lea.vmem %s26_s25, 8192  ;;  %p470_p1 = scmp.lt.s32.totalorder %s26_s25, %s26_s25 }
   0x4   :  { %p466_p0 = scmp.ne.s32.totalorder %s26_s25, %s465_s26  ;;  %p471_p2 = scmp.lt.s32.totalorder %s465_s26, %s465_s26 }
   0x6   :  { %p472_p3 = por %p471_p2, %p470_p1 }
   0x8   :  { %p473_p4 = pnand %p472_p3, %p466_p0 }
   0xa   :  { %476 = shalt.err (!%p473_p4)
}
   0xb   :  { %s502_s27 = smov 256   ;;  %s503_s28 = smov 16  }
   0xc   :  { %31 = dma.hbm_to_vmem [thread:$0]  %s675_s3, 8192, %s26_s25, [#allocation3], %s502_s27, %s502_s27, %s503_s28  }
   0xd   :  { %497 = dma.done.wait [#allocation3], 8192  }
   0xe   :  { %498 = vsyncadd [#allocation3], 4294959104  ;;  %v504_v0 = vmov 0.0   ;;  %v45_v1 = vld [vmem:[%s673_s1 + $0x18] sm:$0xff]  ;;  %v44_v2 = vld [vmem:[%s673_s1 + $0x10] sm:$0xff]  ;;  %vm154_vm0 = vcmask 130048  }
   0xf   :  { %222 = vmatprep.mubr.f32.mxu0 %v504_v0  ;;  %v43_v3 = vld [vmem:[%s673_s1 + $0x8] sm:$0xff]  ;;  %186 = vmatprep.subr.mxu0 %v45_v1  ;;  %v42_v4 = vld [vmem:[%s673_s1] sm:$0xff]  ;;  %v77_v6 = vld [vmem:[#allocation2 + $0xf8] sm:$0xff]  ;;  %vm396_vm1 = vcmask 64512  }
  0x10   :  { %v41_v5 = vld [vmem:[%s672_s0] sm:$0xff]  ;;  %187 = vmatpush1.msra.mxu0 %v44_v2  ;;  %243 = vmatprep.subr.mxu1 %v77_v6  ;;  %v76_v7 = vld [vmem:[#allocation2 + $0xf0] sm:$0xff]  ;;  %v75_v8 = vld [vmem:[#allocation2 + $0xe8] sm:$0xff] }
  0x11   :  { %v74_v9 = vld [vmem:[#allocation2 + $0xe0] sm:$0xff]  ;;  %188 = vmatprep.subr.mxu0 %v43_v3  ;;  %244 = vmatpush1.msra.mxu1 %v76_v7  ;;  %v73_v10 = vld [vmem:[#allocation2 + $0xd8] sm:$0xff]  ;;  %v72_v11 = vld [vmem:[#allocation2 + $0xd0] sm:$0xff] }
  0x12   :  { %189 = vmatpush1.msra.mxu0 %v42_v4  ;;  %245 = vmatprep.subr.mxu1 %v75_v8  ;;  %v71_v12 = vld [vmem:[#allocation2 + $0xc8] sm:$0xff]  ;;  %v70_v13 = vld [vmem:[#allocation2 + $0xc0] sm:$0xff]  ;;  %v69_v14 = vld [vmem:[#allocation2 + $0xb8] sm:$0xff] }
  0x13   :  { %413 = vmatmul.mubr.msk.f32.vlgmr.msra.gmra.mxu0 %vm154_vm0, %v41_v5  ;;  %246 = vmatpush1.msra.mxu1 %v74_v9  ;;  %v68_v15 = vld [vmem:[#allocation2 + $0xb0] sm:$0xff]  ;;  %v67_v16 = vld [vmem:[#allocation2 + $0xa8] sm:$0xff]  ;;  %v66_v17 = vld [vmem:[#allocation2 + $0xa0] sm:$0xff] }
  0x14   :  { %247 = vmatprep.subr.mxu1 %v73_v10  ;;  %v65_v18 = vld [vmem:[#allocation2 + $0x98] sm:$0xff]  ;;  %v64_v19 = vld [vmem:[#allocation2 + $0x90] sm:$0xff]  ;;  %v63_v20 = vld [vmem:[#allocation2 + $0x88] sm:$0xff] }
  0x15   :  { %248 = vmatpush1.msra.mxu1 %v72_v11  ;;  %v62_v21 = vld [vmem:[#allocation2 + $0x80] sm:$0xff]  ;;  %v61_v22 = vld [vmem:[#allocation2 + $0x78] sm:$0xff]  ;;  %v60_v23 = vld [vmem:[#allocation2 + $0x70] sm:$0xff] }
  0x16   :  { %249 = vmatprep.subr.mxu1 %v71_v12  ;;  %v59_v24 = vld [vmem:[#allocation2 + $0x68] sm:$0xff]  ;;  %v58_v25 = vld [vmem:[#allocation2 + $0x60] sm:$0xff]  ;;  %v57_v26 = vld [vmem:[#allocation2 + $0x58] sm:$0xff] }
  0x17   :  { %250 = vmatpush1.msra.mxu1 %v70_v13  ;;  %v56_v27 = vld [vmem:[#allocation2 + $0x50] sm:$0xff]  ;;  %v55_v28 = vld [vmem:[#allocation2 + $0x48] sm:$0xff]  ;;  %v54_v29 = vld [vmem:[#allocation2 + $0x40] sm:$0xff] }
  0x18   :  { %251 = vmatprep.subr.mxu1 %v69_v14  ;;  %v53_v30 = vld [vmem:[#allocation2 + $0x38] sm:$0xff]  ;;  %v52_v31 = vld [vmem:[#allocation2 + $0x30] sm:$0xff]  ;;  %v51_v32 = vld [vmem:[#allocation2 + $0x28] sm:$0xff] }
  0x19   :  { %252 = vmatpush1.msra.mxu1 %v68_v15  ;;  %v50_v33 = vld [vmem:[#allocation2 + $0x20] sm:$0xff]  ;;  %v49_v34 = vld [vmem:[#allocation2 + $0x18] sm:$0xff]  ;;  %v48_v35 = vld [vmem:[#allocation2 + $0x10] sm:$0xff] }
  0x1a   :  { %253 = vmatprep.subr.mxu1 %v67_v16  ;;  %v47_v36 = vld [vmem:[#allocation2 + $0x8] sm:$0xff]  ;;  %v46_v37 = vld [vmem:[#allocation2] sm:$0xff]  ;;  %v109_v38 = vld [vmem:[#allocation2 + $0x1f8] sm:$0xff] }
  0x1b   :  { %254 = vmatpush1.msra.mxu1 %v66_v17  ;;  %v108_v39 = vld [vmem:[#allocation2 + $0x1f0] sm:$0xff]  ;;  %v107_v40 = vld [vmem:[#allocation2 + $0x1e8] sm:$0xff]  ;;  %v106_v41 = vld [vmem:[#allocation2 + $0x1e0] sm:$0xff] }
  0x1c   :  { %255 = vmatprep.subr.mxu1 %v65_v18  ;;  %v105_v42 = vld [vmem:[#allocation2 + $0x1d8] sm:$0xff]  ;;  %v104_v43 = vld [vmem:[#allocation2 + $0x1d0] sm:$0xff]  ;;  %v103_v44 = vld [vmem:[#allocation2 + $0x1c8] sm:$0xff] }
  0x1d   :  { %256 = vmatpush1.msra.mxu1 %v64_v19  ;;  %v102_v45 = vld [vmem:[#allocation2 + $0x1c0] sm:$0xff]  ;;  %v101_v46 = vld [vmem:[#allocation2 + $0x1b8] sm:$0xff]  ;;  %v100_v47 = vld [vmem:[#allocation2 + $0x1b0] sm:$0xff] }
  0x1e   :  { %257 = vmatprep.subr.mxu1 %v63_v20  ;;  %v99_v48 = vld [vmem:[#allocation2 + $0x1a8] sm:$0xff]  ;;  %v98_v49 = vld [vmem:[#allocation2 + $0x1a0] sm:$0xff]  ;;  %v97_v50 = vld [vmem:[#allocation2 + $0x198] sm:$0xff] }
  0x1f   :  { %258 = vmatpush1.msra.mxu1 %v62_v21  ;;  %v96_v51 = vld [vmem:[#allocation2 + $0x190] sm:$0xff]  ;;  %v95_v52 = vld [vmem:[#allocation2 + $0x188] sm:$0xff]  ;;  %v94_v53 = vld [vmem:[#allocation2 + $0x180] sm:$0xff] }
  0x20   :  { %259 = vmatprep.subr.mxu1 %v61_v22  ;;  %v93_v54 = vld [vmem:[#allocation2 + $0x178] sm:$0xff]  ;;  %v92_v55 = vld [vmem:[#allocation2 + $0x170] sm:$0xff]  ;;  %v91_v56 = vld [vmem:[#allocation2 + $0x168] sm:$0xff] }
  0x21   :  { %260 = vmatpush1.msra.mxu1 %v60_v23  ;;  %v90_v57 = vld [vmem:[#allocation2 + $0x160] sm:$0xff]  ;;  %v89_v58 = vld [vmem:[#allocation2 + $0x158] sm:$0xff]  ;;  %v88_v59 = vld [vmem:[#allocation2 + $0x150] sm:$0xff] }
  0x22   :  { %261 = vmatprep.subr.mxu1 %v59_v24  ;;  %v87_v60 = vld [vmem:[#allocation2 + $0x148] sm:$0xff]  ;;  %v86_v61 = vld [vmem:[#allocation2 + $0x140] sm:$0xff]  ;;  %v85_v62 = vld [vmem:[#allocation2 + $0x138] sm:$0xff] }
  0x23   :  { %262 = vmatpush1.msra.mxu1 %v58_v25  ;;  %v84_v63 = vld [vmem:[#allocation2 + $0x130] sm:$0xff]  ;;  %v83_v0 = vld [vmem:[#allocation2 + $0x128] sm:$0xff]  ;;  %v82_v1 = vld [vmem:[#allocation2 + $0x120] sm:$0xff] }
  0x24   :  { %263 = vmatprep.subr.mxu1 %v57_v26  ;;  %v81_v2 = vld [vmem:[#allocation2 + $0x118] sm:$0xff]  ;;  %v80_v3 = vld [vmem:[#allocation2 + $0x110] sm:$0xff]  ;;  %v79_v4 = vld [vmem:[#allocation2 + $0x108] sm:$0xff] }
  0x25   :  { %264 = vmatpush1.msra.mxu1 %v56_v27  ;;  %v78_v5 = vld [vmem:[#allocation2 + $0x100] sm:$0xff]  ;;  %v141_v6 = vld [vmem:[%s677_s5 + $0xf8] sm:$0xff]  ;;  %v140_v8 = vld [vmem:[%s677_s5 + $0xf0] sm:$0xff] }
  0x26   :  { %265 = vmatprep.subr.mxu1 %v55_v28  ;;  %v125_v7 = vld [vmem:[%s677_s5 + $0x78] sm:$0xff]  ;;  %415 = vmatprep.subr.mxu0 %v141_v6  ;;  %v124_v9 = vld [vmem:[%s677_s5 + $0x70] sm:$0xff]  ;;  %v139_v10 = vld [vmem:[%s677_s5 + $0xe8] sm:$0xff] }
  0x27   :  { %266 = vmatpush1.msra.mxu1 %v54_v29  ;;  %416 = vmatpush3.msra.mxu0 %v125_v7  ;;  %v123_v11 = vld [vmem:[%s677_s5 + $0x68] sm:$0xff]  ;;  %v138_v12 = vld [vmem:[%s677_s5 + $0xe0] sm:$0xff]  ;;  %v137_v14 = vld [vmem:[%s677_s5 + $0xd8] sm:$0xff] }
  0x28   :  { %267 = vmatprep.subr.mxu1 %v53_v30  ;;  %417 = vmatprep.subr.mxu0 %v140_v8  ;;  %v122_v13 = vld [vmem:[%s677_s5 + $0x60] sm:$0xff]  ;;  %v121_v15 = vld [vmem:[%s677_s5 + $0x58] sm:$0xff]  ;;  %v136_v16 = vld [vmem:[%s677_s5 + $0xd0] sm:$0xff]  ;;  %v144_v30 = vlaneseq }
  0x29   :  { %268 = vmatpush1.msra.mxu1 %v52_v31  ;;  %418 = vmatpush3.msra.mxu0 %v124_v9  ;;  %v120_v17 = vld [vmem:[%s677_s5 + $0x50] sm:$0xff]  ;;  %v135_v18 = vld [vmem:[%s677_s5 + $0xc8] sm:$0xff]  ;;  %v134_v20 = vld [vmem:[%s677_s5 + $0xc0] sm:$0xff] }
  0x2a   :  { %269 = vmatprep.subr.mxu1 %v51_v32  ;;  %419 = vmatprep.subr.mxu0 %v139_v10  ;;  %v119_v19 = vld [vmem:[%s677_s5 + $0x48] sm:$0xff]  ;;  %v118_v21 = vld [vmem:[%s677_s5 + $0x40] sm:$0xff]  ;;  %v133_v22 = vld [vmem:[%s677_s5 + $0xb8] sm:$0xff]  ;;  %v145_v31 = vshrl.u32 %v144_v30, 7 }
  0x2b   :  { %270 = vmatpush1.msra.mxu1 %v50_v33  ;;  %420 = vmatpush3.msra.mxu0 %v123_v11  ;;  %v117_v23 = vld [vmem:[%s677_s5 + $0x38] sm:$0xff]  ;;  %v132_v24 = vld [vmem:[%s677_s5 + $0xb0] sm:$0xff]  ;;  %v131_v26 = vld [vmem:[%s677_s5 + $0xa8] sm:$0xff] }
  0x2c   :  { %271 = vmatprep.subr.mxu1 %v49_v34  ;;  %421 = vmatprep.subr.mxu0 %v138_v12  ;;  %v116_v25 = vld [vmem:[%s677_s5 + $0x30] sm:$0xff]  ;;  %v115_v27 = vld [vmem:[%s677_s5 + $0x28] sm:$0xff]  ;;  %v130_v28 = vld [vmem:[%s677_s5 + $0xa0] sm:$0xff]  ;;  %v146_v32 = vsub.s32 0, %v145_v31  ;;  %v150_v34 = vsub.s32 1, %v145_v31 }
  0x2d   :  { %272 = vmatpush1.msra.mxu1 %v48_v35  ;;  %422 = vmatpush3.msra.mxu0 %v122_v13  ;;  %v114_v29 = vld [vmem:[%s677_s5 + $0x20] sm:$0xff] }
  0x2e   :  { %273 = vmatprep.subr.mxu1 %v47_v36  ;;  %423 = vmatprep.subr.mxu0 %v137_v14  ;;  %v142_v33 = vld [vmem:[%s674_s2] sm:$0x3] }
  0x2f   :  { %274 = vmatpush1.msra.mxu1 %v46_v37  ;;  %424 = vmatpush3.msra.mxu0 %v121_v15  ;;  %v147_v35 = vrot.slane %v142_v33, %v146_v32  ;;  %v151_v36 = vrot.slane %v142_v33, %v150_v34 }
  0x30   :  { %275 = vmatprep.subr.mxu1 %v109_v38  ;;  %425 = vmatprep.subr.mxu0 %v136_v16 }
  0x31   :  { %276 = vmatpush2.msra.mxu1 %v108_v39  ;;  %426 = vmatpush3.msra.mxu0 %v120_v17 }
  0x32   :  { %277 = vmatprep.subr.mxu1 %v107_v40  ;;  %427 = vmatprep.subr.mxu0 %v135_v18 }
  0x33   :  { %278 = vmatpush2.msra.mxu1 %v106_v41  ;;  %428 = vmatpush3.msra.mxu0 %v119_v19 }
  0x34   :  { %279 = vmatprep.subr.mxu1 %v105_v42  ;;  %429 = vmatprep.subr.mxu0 %v134_v20 }
  0x35   :  { %280 = vmatpush2.msra.mxu1 %v104_v43  ;;  %430 = vmatpush3.msra.mxu0 %v118_v21  ;;  %v129_v43 = vld [vmem:[%s677_s5 + $0x98] sm:$0xff] }
  0x36   :  { %281 = vmatprep.subr.mxu1 %v103_v44  ;;  %431 = vmatprep.subr.mxu0 %v133_v22  ;;  %v113_v44 = vld [vmem:[%s677_s5 + $0x18] sm:$0xff] }
  0x37   :  { %282 = vmatpush2.msra.mxu1 %v102_v45  ;;  %432 = vmatpush3.msra.mxu0 %v117_v23  ;;  %v128_v45 = vld [vmem:[%s677_s5 + $0x90] sm:$0xff] }
  0x38   :  { %283 = vmatprep.subr.mxu1 %v101_v46  ;;  %433 = vmatprep.subr.mxu0 %v132_v24  ;;  %v112_v46 = vld [vmem:[%s677_s5 + $0x10] sm:$0xff] }
  0x39   :  { %284 = vmatpush2.msra.mxu1 %v100_v47  ;;  %434 = vmatpush3.msra.mxu0 %v116_v25  ;;  %v127_v47 = vld [vmem:[%s677_s5 + $0x88] sm:$0xff] }
  0x3a   :  { %285 = vmatprep.subr.mxu1 %v99_v48  ;;  %435 = vmatprep.subr.mxu0 %v131_v26  ;;  %v111_v48 = vld [vmem:[%s677_s5 + $0x8] sm:$0xff] }
  0x3b   :  { %286 = vmatpush2.msra.mxu1 %v98_v49  ;;  %436 = vmatpush3.msra.mxu0 %v115_v27  ;;  %v126_v49 = vld [vmem:[%s677_s5 + $0x80] sm:$0xff] }
  0x3c   :  { %287 = vmatprep.subr.mxu1 %v97_v50  ;;  %437 = vmatprep.subr.mxu0 %v130_v28  ;;  %v110_v50 = vld [vmem:[%s677_s5] sm:$0xff] }
  0x3d   :  { %288 = vmatpush2.msra.mxu1 %v96_v51  ;;  %438 = vmatpush3.msra.mxu0 %v114_v29  ;;  %v231_v51 = vld [vmem:[%s676_s4] sm:$0x3]  ;;  %s505_s4 = smov [#allocation5]  }
  0x3e   :  { %289 = vmatprep.subr.mxu1 %v95_v52  ;;  %439 = vmatprep.subr.mxu0 %v129_v43  ;;  %v236_v52 = vrot.slane %v231_v51, %v146_v32  ;;  %s404_s5 = sshll.u32 %s505_s4, 4  ;;  %s405_s5 = int_to_ptr.vmem [resolvable:$true] %s404_s5 }
  0x3f   :  { %290 = vmatpush2.msra.mxu1 %v94_v53  ;;  %440 = vmatpush3.msra.mxu0 %v113_v44  ;;  %v240_v53 = vrot.slane %v231_v51, %v150_v34  ;;  %s477_s9 = scalar_lea.vmem %s405_s5, 128  ;;  %p482_p6 = scmp.lt.s32.totalorder %s405_s5, %s405_s5 }
  0x40   :  { %291 = vmatprep.subr.mxu1 %v93_v54  ;;  %441 = vmatprep.subr.mxu0 %v128_v45  ;;  %p478_p5 = scmp.ne.s32.totalorder %s405_s5, %s477_s9  ;;  %p483_p7 = scmp.lt.s32.totalorder %s477_s9, %s477_s9 }
  0x41   :  { %292 = vmatpush2.msra.mxu1 %v92_v55  ;;  %442 = vmatpush3.msra.mxu0 %v112_v46 }
  0x42   :  { %293 = vmatprep.subr.mxu1 %v91_v56  ;;  %443 = vmatprep.subr.mxu0 %v127_v47  ;;  %p484_p8 = por %p483_p7, %p482_p6 }
  0x43   :  { %294 = vmatpush2.msra.mxu1 %v90_v57  ;;  %444 = vmatpush3.msra.mxu0 %v111_v48 }
  0x44   :  { %295 = vmatprep.subr.mxu1 %v89_v58  ;;  %445 = vmatprep.subr.mxu0 %v126_v49  ;;  %p485_p9 = pnand %p484_p8, %p478_p5 }
  0x45   :  { %296 = vmatpush2.msra.mxu1 %v88_v59  ;;  %446 = vmatpush3.msra.mxu0 %v110_v50 }
  0x46   :  { %297 = vmatprep.subr.mxu1 %v87_v60 }
  0x47   :  { %298 = vmatpush2.msra.mxu1 %v86_v61  ;;  %v414_v61 = vld [vmem:[%s678_s6] ss:$0 sm:$0xff] }
  0x48   :  { %299 = vmatprep.subr.mxu1 %v85_v62 }
  0x49   :  { %300 = vmatpush2.msra.mxu1 %v84_v63 }
  0x4a   :  { %301 = vmatprep.subr.mxu1 %v83_v0 }
  0x4b   :  { %302 = vmatpush2.msra.mxu1 %v82_v1 }
  0x4c   :  { %303 = vmatprep.subr.mxu1 %v81_v2 }
  0x4d   :  { %304 = vmatpush2.msra.mxu1 %v80_v3 }
  0x4e   :  { %305 = vmatprep.subr.mxu1 %v79_v4 }
  0x4f   :  { %306 = vmatpush2.msra.mxu1 %v78_v5 }
  0xd3   :  { %v224_v37 = vpop.f32.mrf.mxu0 }
  0xd4   :  { %v225_v38 = vadd.f32 %v224_v37, %v147_v35 }
  0xd5   :  { %v226_v39 = vpop.f32.mrf.mxu0 }
  0xd6   :  { %v227_v40 = vadd.f32 %v226_v39, %v151_v36  ;;  %v229_v42 = vmax.f32 %v225_v38, 0.0 }
  0xd8   :  { %v230_v41 = vmax.f32 %v227_v40, 0.0 }
  0xda   :  { %307 = vmatprep.mubr.f32.mxu1 %v230_v41 }
  0xdb   :  { %308 = vmatmul.mubr.f32.vlgmr.msra.gmra.mxu1 %v229_v42 }
 0x19b   :  { %v309_v54 = vpop.f32.mrf.mxu1 }
 0x19c   :  { %v310_v55 = vadd.f32 %v309_v54, %v236_v52 }
 0x19d   :  { %v311_v56 = vpop.f32.mrf.mxu1 }
 0x19e   :  { %v312_v57 = vadd.f32 %v311_v56, %v240_v53  ;;  %v314_v59 = vmax.f32 %v310_v55, 0.0 }
 0x1a0   :  { %v315_v58 = vmax.f32 %v312_v57, 0.0 }
 0x1a2   :  { %387 = vmatprep.mubr.f32.mxu0 %v315_v58 }
 0x1a3   :  { %388 = vmatmul.mubr.f32.vlgmr.msra.gmra.mxu0 %v314_v59 }
 0x263   :  { %v447_v60 = vpop.f32.mrf.mxu0 }
 0x265   :  { %v448_v62 = vpop.f32.mrf.mxu0 }
 0x266   :  { %v449_v63 = vadd.f32 %v448_v62, %v447_v60 }
 0x268   :  { %v390_v0 = vadd.f32 %v449_v63, %v414_v61 }
 0x26a   :  { %455 = vtanh.f32 %v390_v0 }
 0x277   :  { %v456_v1 = vpop.eup %455 }
 0x278   :  { %v394_v2 = vmul.f32 50.0, %v456_v1 }
 0x27a   :  { %v395_v3 = vadd.f32 50.0, %v394_v2 }
 0x27c   :  { %397 = vst.msk [vmem:[#allocation5] sm:$0xff] %vm396_vm1, %v395_v3 }
 0x27d   :  { %488 = shalt.err (!%p485_p9)
}
 0x27e   :  { %407 = dma.vmem_to_hbm [thread:$0]  %s405_s5, 128, %s679_s7, [#allocation4]  }
 0x27f   :  { %499 = dma.done.wait [#allocation4], 128  }
 0x280   :  { %500 = vsyncadd [#allocation4], 4294967168 }
 0x281   :  { %411 = vsyncpa [#allocation3], 1 }
 0x282   :  { %412 = vsyncpa [#allocation4], 1 }

</bundles_post_ra>
